<compile_context>
chip_gen: v6e
topology: v6e:2x2x1
jax: 0.10.0
libtpu: 0.0.40
codegen_flags: <defaults>
</compile_context>

<pallas_src>
import functools

import numpy as np
import jax
import jax.numpy as jnp
from jax.experimental import pallas as pl
from jax.experimental.pallas import tpu as pltpu


def heatmap_kernel(xp_ref, mask_ref, w1t_ref, scale_ref, bias_ref, w2t_ref,
                   b2_ref, o_ref, *, H, W):
    # xp_ref   : (Cin_p, PAD + H*W + PAD) flattened, halo-padded input (1 image)
    # mask_ref : (9, 1, H*W)              border-validity masks per 3x3 tap
    # w1t_ref  : (Cmid, 9*Cin_p)          3x3 conv weights, transposed im2col
    # scale/bias_ref : (Cmid, 1)          folded eval-mode BatchNorm affine
    # w2t_ref  : (NC, Cmid), b2_ref (NC,1)  1x1 conv (transposed) + bias
    # o_ref    : (NC, H*W)                lane-dense output block
    HW = H * W
    PAD = W + 1
    taps = []
    for ky in range(3):
        for kx in range(3):
            off = (ky - 1) * W + (kx - 1)                    # flattened shift
            win = xp_ref[:, PAD + off: PAD + off + HW]       # (Cin_p, HW)
            taps.append(win * mask_ref[ky * 3 + kx])         # zero invalid taps
    patch = jnp.concatenate(taps, axis=0)                    # (9*Cin_p, HW)

    # 3x3 conv as a single MXU matmul (K = 9*Cin_p), channels-major result.
    h = jnp.dot(w1t_ref[...], patch,
                preferred_element_type=jnp.float32)          # (Cmid, HW)
    # Folded BatchNorm + ReLU: lane-dense VPU work on (Cmid, 256).
    h = jnp.maximum(h * scale_ref[...] + bias_ref[...], 0.0)
    # 1x1 conv + bias + sigmoid; stored lane-dense as (NC, HW).
    logits = jnp.dot(w2t_ref[...], h,
                     preferred_element_type=jnp.float32) + b2_ref[...]
    o_ref[...] = jax.nn.sigmoid(logits)


def heatmap_head(x_nchw, w1, bn_gamma, bn_beta, bn_mean, bn_var, w2, b2,
                 eps=1e-5):
    """x_nchw: (B, Cin, H, W) float32 -> (B, NC, H, W) float32."""
    B, Cin, H, W = x_nchw.shape
    Cmid = w1.shape[-1]
    NC = w2.shape[-1]
    HW = H * W
    PAD = W + 1                     # halo so every 3x3 tap is an in-bounds slice
    Cin_p = ((Cin + 7) // 8) * 8    # pad channels up to a full sublane tile

    # NCHW -> (B, Cin, H*W) is a free layout-preserving reshape (no transpose);
    # the only real wrapper data op is this single small pad.
    x2 = x_nchw.reshape(B, Cin, HW).astype(jnp.float32)
    xp = jnp.pad(x2, ((0, 0), (0, Cin_p - Cin), (PAD, PAD)))

    # ---- one-time parameter re-layouts (tiny / constant-foldable) ----------
    # 3x3 conv HWIO (3,3,Cin,Cmid) -> transposed im2col matrix (Cmid, 9*Cin_p).
    w1f = jnp.pad(w1.astype(jnp.float32).reshape(9, Cin, Cmid),
                  ((0, 0), (0, Cin_p - Cin), (0, 0))).reshape(9 * Cin_p, Cmid)
    w1t = w1f.T                                            # (Cmid, 9*Cin_p)
    # Eval-mode BatchNorm folded into per-channel affine (channels-major).
    scale = (bn_gamma / jnp.sqrt(bn_var + eps)).astype(jnp.float32)
    bias = (bn_beta - bn_mean * scale).astype(jnp.float32)
    scale_c = scale.reshape(Cmid, 1)
    bias_c = bias.reshape(Cmid, 1)
    w2t = jnp.transpose(w2.astype(jnp.float32))            # (NC, Cmid)
    b2c = b2.astype(jnp.float32).reshape(NC, 1)

    # Border-validity masks for the 9 taps (compile-time numpy constants).
    hh = np.arange(HW) // W
    ww = np.arange(HW) % W
    mask_np = np.zeros((9, 1, HW), np.float32)
    for ky in range(3):
        for kx in range(3):
            dy, dx = ky - 1, kx - 1
            valid = ((hh + dy >= 0) & (hh + dy < H) &
                     (ww + dx >= 0) & (ww + dx < W))
            mask_np[ky * 3 + kx, 0, :] = valid
    masks = jnp.asarray(mask_np)

    kern = functools.partial(heatmap_kernel, H=H, W=W)

    out2 = pl.pallas_call(
        kern,
        out_shape=jax.ShapeDtypeStruct((B, NC, HW), jnp.float32),
        grid=(B,),
        in_specs=[
            pl.BlockSpec((None, Cin_p, HW + 2 * PAD), lambda b: (b, 0, 0)),
            pl.BlockSpec((9, 1, HW), lambda b: (0, 0, 0)),
            pl.BlockSpec((Cmid, 9 * Cin_p), lambda b: (0, 0)),
            pl.BlockSpec((Cmid, 1), lambda b: (0, 0)),
            pl.BlockSpec((Cmid, 1), lambda b: (0, 0)),
            pl.BlockSpec((NC, Cmid), lambda b: (0, 0)),
            pl.BlockSpec((NC, 1), lambda b: (0, 0)),
        ],
        # (B, NC, H*W) is already NCHW order -> wrapper reshape below is free.
        out_specs=pl.BlockSpec((None, NC, HW), lambda b: (b, 0, 0)),
        compiler_params=pltpu.CompilerParams(
            dimension_semantics=("parallel",)),
        # TODO(synk): for B == 1 on v7x (2 TensorCores), add a second parallel
        # grid axis splitting H so both cores get work.
    )(xp, masks, w1t, scale_c, bias_c, w2t, b2c)

    return out2.reshape(B, NC, H, W)


def reference_jax(x_nchw, w1, bn_gamma, bn_beta, bn_mean, bn_var, w2, b2,
                  eps=1e-5):
    x = jnp.transpose(x_nchw, (0, 2, 3, 1)).astype(jnp.float32)  # NHWC
    y = jax.lax.conv_general_dilated(
        x, w1.astype(jnp.float32),
        window_strides=(1, 1), padding="SAME",
        dimension_numbers=("NHWC", "HWIO", "NHWC"))
    scale = bn_gamma / jnp.sqrt(bn_var + eps)
    y = y * scale + (bn_beta - bn_mean * scale)
    y = jnp.maximum(y, 0.0)
    y = jnp.einsum("bhwc,cn->bhwn", y, w2.astype(jnp.float32)) + b2
    y = jax.nn.sigmoid(y)
    return jnp.transpose(y, (0, 3, 1, 2))


if __name__ == "__main__":
    B, Cin, H, W = 2, 4, 16, 16
    Cmid, NC = 64, 8

    key = jax.random.PRNGKey(0)
    k1, k2, k3, k4, k5, k6, k7, kx = jax.random.split(key, 8)

    # Deterministic synthetic parameters (shapes per the module __init__).
    w1 = 0.1 * jax.random.normal(k1, (3, 3, Cin, Cmid), jnp.float32)   # conv1 (HWIO)
    bn_gamma = 1.0 + 0.1 * jax.random.normal(k2, (Cmid,), jnp.float32)
    bn_beta = 0.1 * jax.random.normal(k3, (Cmid,), jnp.float32)
    bn_mean = 0.05 * jax.random.normal(k4, (Cmid,), jnp.float32)
    bn_var = jnp.abs(jax.random.normal(k5, (Cmid,), jnp.float32)) + 0.5
    w2 = 0.1 * jax.random.normal(k6, (Cmid, NC), jnp.float32)          # conv2 (1x1)
    b2 = 0.1 * jax.random.normal(k7, (NC,), jnp.float32)

    x = jax.random.normal(kx, (B, Cin, H, W), jnp.float32)             # NCHW input

    heatmap_fn = jax.jit(heatmap_head)
    out = jax.block_until_ready(
        heatmap_fn(x, w1, bn_gamma, bn_beta, bn_mean, bn_var, w2, b2))

    ref = jax.block_until_ready(
        reference_jax(x, w1, bn_gamma, bn_beta, bn_mean, bn_var, w2, b2))

    assert out.shape == (B, NC, H, W), out.shape
    assert jnp.allclose(out, ref, atol=1e-5, rtol=1e-5), \
        float(jnp.max(jnp.abs(out - ref)))

    print("KERNEL_OK")
</pallas_src>

<mosaic_0001>
module attributes {stable_mosaic.version = 11 : i64} {
  func.func @heatmap_kernel(%arg0: i32, %arg1: memref<1x8x290xf32, #tpu.memory_space<vmem>>, %arg2: memref<9x1x256xf32, #tpu.memory_space<vmem>>, %arg3: memref<64x72xf32, #tpu.memory_space<vmem>>, %arg4: memref<64x1xf32, #tpu.memory_space<vmem>>, %arg5: memref<64x1xf32, #tpu.memory_space<vmem>>, %arg6: memref<8x64xf32, #tpu.memory_space<vmem>>, %arg7: memref<8x1xf32, #tpu.memory_space<vmem>>, %arg8: memref<1x8x256xf32, #tpu.memory_space<vmem>>) attributes {dimension_semantics = [#tpu.dimension_semantics<parallel>], iteration_bounds = array<i64: 2>, scalar_prefetch = 0 : i64, scratch_operands = 0 : i64, tpu.core_type = #tpu.core_type<tc>, window_params = [{transform_indices = @transform_0, window_bounds = array<i64: 1, 8, 290>}, {pipeline_mode = #tpu.pipeline_mode<synchronous>, transform_indices = @transform_1, window_bounds = array<i64: 9, 1, 256>}, {pipeline_mode = #tpu.pipeline_mode<synchronous>, transform_indices = @transform_2, window_bounds = array<i64: 64, 72>}, {pipeline_mode = #tpu.pipeline_mode<synchronous>, transform_indices = @transform_3, window_bounds = array<i64: 64, 1>}, {pipeline_mode = #tpu.pipeline_mode<synchronous>, transform_indices = @transform_4, window_bounds = array<i64: 64, 1>}, {pipeline_mode = #tpu.pipeline_mode<synchronous>, transform_indices = @transform_5, window_bounds = array<i64: 8, 64>}, {pipeline_mode = #tpu.pipeline_mode<synchronous>, transform_indices = @transform_6, window_bounds = array<i64: 8, 1>}, {transform_indices = @transform_7, window_bounds = array<i64: 1, 8, 256>}]} {
    %c0 = arith.constant 0 : index
    %c0_0 = arith.constant 0 : index
    %c0_1 = arith.constant 0 : index
    %0 = vector.load %arg1[%c0, %c0_0, %c0_1] : memref<1x8x290xf32, #tpu.memory_space<vmem>>, vector<1x8x256xf32>
    %1 = vector.shape_cast %0 : vector<1x8x256xf32> to vector<8x256xf32>
    %c0_2 = arith.constant 0 : index
    %c0_3 = arith.constant 0 : index
    %c0_4 = arith.constant 0 : index
    %2 = vector.load %arg2[%c0_2, %c0_3, %c0_4] : memref<9x1x256xf32, #tpu.memory_space<vmem>>, vector<1x1x256xf32>
    %3 = vector.shape_cast %2 : vector<1x1x256xf32> to vector<1x256xf32>
    %4 = vector.broadcast %3 : vector<1x256xf32> to vector<8x256xf32>
    %5 = arith.mulf %1, %4 : vector<8x256xf32>
    %c0_5 = arith.constant 0 : index
    %c0_6 = arith.constant 0 : index
    %c1 = arith.constant 1 : index
    %6 = vector.load %arg1[%c0_5, %c0_6, %c1] : memref<1x8x290xf32, #tpu.memory_space<vmem>>, vector<1x8x256xf32>
    %7 = vector.shape_cast %6 : vector<1x8x256xf32> to vector<8x256xf32>
    %c1_7 = arith.constant 1 : index
    %c0_8 = arith.constant 0 : index
    %c0_9 = arith.constant 0 : index
    %8 = vector.load %arg2[%c1_7, %c0_8, %c0_9] : memref<9x1x256xf32, #tpu.memory_space<vmem>>, vector<1x1x256xf32>
    %9 = vector.shape_cast %8 : vector<1x1x256xf32> to vector<1x256xf32>
    %10 = vector.broadcast %9 : vector<1x256xf32> to vector<8x256xf32>
    %11 = arith.mulf %7, %10 : vector<8x256xf32>
    %c0_10 = arith.constant 0 : index
    %c0_11 = arith.constant 0 : index
    %c2 = arith.constant 2 : index
    %12 = vector.load %arg1[%c0_10, %c0_11, %c2] : memref<1x8x290xf32, #tpu.memory_space<vmem>>, vector<1x8x256xf32>
    %13 = vector.shape_cast %12 : vector<1x8x256xf32> to vector<8x256xf32>
    %c2_12 = arith.constant 2 : index
    %c0_13 = arith.constant 0 : index
    %c0_14 = arith.constant 0 : index
    %14 = vector.load %arg2[%c2_12, %c0_13, %c0_14] : memref<9x1x256xf32, #tpu.memory_space<vmem>>, vector<1x1x256xf32>
    %15 = vector.shape_cast %14 : vector<1x1x256xf32> to vector<1x256xf32>
    %16 = vector.broadcast %15 : vector<1x256xf32> to vector<8x256xf32>
    %17 = arith.mulf %13, %16 : vector<8x256xf32>
    %c0_15 = arith.constant 0 : index
    %c0_16 = arith.constant 0 : index
    %c16 = arith.constant 16 : index
    %18 = vector.load %arg1[%c0_15, %c0_16, %c16] : memref<1x8x290xf32, #tpu.memory_space<vmem>>, vector<1x8x256xf32>
    %19 = vector.shape_cast %18 : vector<1x8x256xf32> to vector<8x256xf32>
    %c3 = arith.constant 3 : index
    %c0_17 = arith.constant 0 : index
    %c0_18 = arith.constant 0 : index
    %20 = vector.load %arg2[%c3, %c0_17, %c0_18] : memref<9x1x256xf32, #tpu.memory_space<vmem>>, vector<1x1x256xf32>
    %21 = vector.shape_cast %20 : vector<1x1x256xf32> to vector<1x256xf32>
    %22 = vector.broadcast %21 : vector<1x256xf32> to vector<8x256xf32>
    %23 = arith.mulf %19, %22 : vector<8x256xf32>
    %c0_19 = arith.constant 0 : index
    %c0_20 = arith.constant 0 : index
    %c17 = arith.constant 17 : index
    %24 = vector.load %arg1[%c0_19, %c0_20, %c17] : memref<1x8x290xf32, #tpu.memory_space<vmem>>, vector<1x8x256xf32>
    %25 = vector.shape_cast %24 : vector<1x8x256xf32> to vector<8x256xf32>
    %c4 = arith.constant 4 : index
    %c0_21 = arith.constant 0 : index
    %c0_22 = arith.constant 0 : index
    %26 = vector.load %arg2[%c4, %c0_21, %c0_22] : memref<9x1x256xf32, #tpu.memory_space<vmem>>, vector<1x1x256xf32>
    %27 = vector.shape_cast %26 : vector<1x1x256xf32> to vector<1x256xf32>
    %28 = vector.broadcast %27 : vector<1x256xf32> to vector<8x256xf32>
    %29 = arith.mulf %25, %28 : vector<8x256xf32>
    %c0_23 = arith.constant 0 : index
    %c0_24 = arith.constant 0 : index
    %c18 = arith.constant 18 : index
    %30 = vector.load %arg1[%c0_23, %c0_24, %c18] : memref<1x8x290xf32, #tpu.memory_space<vmem>>, vector<1x8x256xf32>
    %31 = vector.shape_cast %30 : vector<1x8x256xf32> to vector<8x256xf32>
    %c5 = arith.constant 5 : index
    %c0_25 = arith.constant 0 : index
    %c0_26 = arith.constant 0 : index
    %32 = vector.load %arg2[%c5, %c0_25, %c0_26] : memref<9x1x256xf32, #tpu.memory_space<vmem>>, vector<1x1x256xf32>
    %33 = vector.shape_cast %32 : vector<1x1x256xf32> to vector<1x256xf32>
    %34 = vector.broadcast %33 : vector<1x256xf32> to vector<8x256xf32>
    %35 = arith.mulf %31, %34 : vector<8x256xf32>
    %c0_27 = arith.constant 0 : index
    %c0_28 = arith.constant 0 : index
    %c32 = arith.constant 32 : index
    %36 = vector.load %arg1[%c0_27, %c0_28, %c32] : memref<1x8x290xf32, #tpu.memory_space<vmem>>, vector<1x8x256xf32>
    %37 = vector.shape_cast %36 : vector<1x8x256xf32> to vector<8x256xf32>
    %c6 = arith.constant 6 : index
    %c0_29 = arith.constant 0 : index
    %c0_30 = arith.constant 0 : index
    %38 = vector.load %arg2[%c6, %c0_29, %c0_30] : memref<9x1x256xf32, #tpu.memory_space<vmem>>, vector<1x1x256xf32>
    %39 = vector.shape_cast %38 : vector<1x1x256xf32> to vector<1x256xf32>
    %40 = vector.broadcast %39 : vector<1x256xf32> to vector<8x256xf32>
    %41 = arith.mulf %37, %40 : vector<8x256xf32>
    %c0_31 = arith.constant 0 : index
    %c0_32 = arith.constant 0 : index
    %c33 = arith.constant 33 : index
    %42 = vector.load %arg1[%c0_31, %c0_32, %c33] : memref<1x8x290xf32, #tpu.memory_space<vmem>>, vector<1x8x256xf32>
    %43 = vector.shape_cast %42 : vector<1x8x256xf32> to vector<8x256xf32>
    %c7 = arith.constant 7 : index
    %c0_33 = arith.constant 0 : index
    %c0_34 = arith.constant 0 : index
    %44 = vector.load %arg2[%c7, %c0_33, %c0_34] : memref<9x1x256xf32, #tpu.memory_space<vmem>>, vector<1x1x256xf32>
    %45 = vector.shape_cast %44 : vector<1x1x256xf32> to vector<1x256xf32>
    %46 = vector.broadcast %45 : vector<1x256xf32> to vector<8x256xf32>
    %47 = arith.mulf %43, %46 : vector<8x256xf32>
    %c0_35 = arith.constant 0 : index
    %c0_36 = arith.constant 0 : index
    %c34 = arith.constant 34 : index
    %48 = vector.load %arg1[%c0_35, %c0_36, %c34] : memref<1x8x290xf32, #tpu.memory_space<vmem>>, vector<1x8x256xf32>
    %49 = vector.shape_cast %48 : vector<1x8x256xf32> to vector<8x256xf32>
    %c8 = arith.constant 8 : index
    %c0_37 = arith.constant 0 : index
    %c0_38 = arith.constant 0 : index
    %50 = vector.load %arg2[%c8, %c0_37, %c0_38] : memref<9x1x256xf32, #tpu.memory_space<vmem>>, vector<1x1x256xf32>
    %51 = vector.shape_cast %50 : vector<1x1x256xf32> to vector<1x256xf32>
    %52 = vector.broadcast %51 : vector<1x256xf32> to vector<8x256xf32>
    %53 = arith.mulf %49, %52 : vector<8x256xf32>
    %54 = tpu.concatenate %5, %11, %17, %23, %29, %35, %41, %47, %53 in 0 : vector<8x256xf32>, vector<8x256xf32>, vector<8x256xf32>, vector<8x256xf32>, vector<8x256xf32>, vector<8x256xf32>, vector<8x256xf32>, vector<8x256xf32>, vector<8x256xf32> -> vector<72x256xf32>
    %c0_39 = arith.constant 0 : index
    %c0_40 = arith.constant 0 : index
    %55 = vector.load %arg3[%c0_39, %c0_40] : memref<64x72xf32, #tpu.memory_space<vmem>>, vector<64x72xf32>
    %cst = arith.constant dense<0.000000e+00> : vector<64x256xf32>
    %56 = tpu.matmul %55, %54, %cst {dimension_numbers = #tpu.dot_dimension_numbers<[1], [0], [0], [1], [0, 0, 1, 1], [], []>} : vector<64x72xf32>, vector<72x256xf32>, vector<64x256xf32> -> vector<64x256xf32>
    %c0_41 = arith.constant 0 : index
    %c0_42 = arith.constant 0 : index
    %57 = vector.load %arg4[%c0_41, %c0_42] : memref<64x1xf32, #tpu.memory_space<vmem>>, vector<64x1xf32>
    %58 = vector.broadcast %57 : vector<64x1xf32> to vector<64x256xf32>
    %59 = arith.mulf %56, %58 : vector<64x256xf32>
    %c0_43 = arith.constant 0 : index
    %c0_44 = arith.constant 0 : index
    %60 = vector.load %arg5[%c0_43, %c0_44] : memref<64x1xf32, #tpu.memory_space<vmem>>, vector<64x1xf32>
    %61 = vector.broadcast %60 : vector<64x1xf32> to vector<64x256xf32>
    %62 = arith.addf %59, %61 : vector<64x256xf32>
    %cst_45 = arith.constant 0.000000e+00 : f32
    %63 = vector.broadcast %cst_45 : f32 to vector<64x256xf32>
    %64 = arith.maximumf %62, %63 : vector<64x256xf32>
    %c0_46 = arith.constant 0 : index
    %c0_47 = arith.constant 0 : index
    %65 = vector.load %arg6[%c0_46, %c0_47] : memref<8x64xf32, #tpu.memory_space<vmem>>, vector<8x64xf32>
    %cst_48 = arith.constant dense<0.000000e+00> : vector<8x256xf32>
    %66 = tpu.matmul %65, %64, %cst_48 {dimension_numbers = #tpu.dot_dimension_numbers<[1], [0], [0], [1], [0, 0, 1, 1], [], []>} : vector<8x64xf32>, vector<64x256xf32>, vector<8x256xf32> -> vector<8x256xf32>
    %c0_49 = arith.constant 0 : index
    %c0_50 = arith.constant 0 : index
    %67 = vector.load %arg7[%c0_49, %c0_50] : memref<8x1xf32, #tpu.memory_space<vmem>>, vector<8x1xf32>
    %68 = vector.broadcast %67 : vector<8x1xf32> to vector<8x256xf32>
    %69 = arith.addf %66, %68 : vector<8x256xf32>
    %70 = arith.negf %69 : vector<8x256xf32>
    %71 = math.exp %70 : vector<8x256xf32>
    %cst_51 = arith.constant 1.000000e+00 : f32
    %72 = vector.broadcast %cst_51 : f32 to vector<8x256xf32>
    %73 = arith.addf %72, %71 : vector<8x256xf32>
    %74 = arith.divf %72, %73 : vector<8x256xf32>
    %c0_52 = arith.constant 0 : index
    %c0_53 = arith.constant 0 : index
    %c0_54 = arith.constant 0 : index
    %75 = vector.load %arg8[%c0_52, %c0_53, %c0_54] : memref<1x8x256xf32, #tpu.memory_space<vmem>>, vector<1x8x256xf32>
    %76 = vector.shape_cast %75 : vector<1x8x256xf32> to vector<8x256xf32>
    %77 = vector.shape_cast %74 : vector<8x256xf32> to vector<1x8x256xf32>
    tpu.vector_store %arg8[%c0_52, %c0_53, %c0_54], %77 {strides = array<i32>} : memref<1x8x256xf32, #tpu.memory_space<vmem>>, vector<1x8x256xf32>,
    return
  }
  func.func @transform_0(%arg0: i32) -> (i32, i32, i32) {
    %c0_i32 = arith.constant 0 : i32
    %c0_i32_0 = arith.constant 0 : i32
    %c0_i32_1 = arith.constant 0 : i32
    return %arg0, %c0_i32, %c0_i32_0 : i32, i32, i32
  }
  func.func @transform_1(%arg0: i32) -> (i32, i32, i32) {
    %c0_i32 = arith.constant 0 : i32
    %c0_i32_0 = arith.constant 0 : i32
    %c0_i32_1 = arith.constant 0 : i32
    %c0_i32_2 = arith.constant 0 : i32
    return %c0_i32, %c0_i32_0, %c0_i32_1 : i32, i32, i32
  }
  func.func @transform_2(%arg0: i32) -> (i32, i32) {
    %c0_i32 = arith.constant 0 : i32
    %c0_i32_0 = arith.constant 0 : i32
    %c0_i32_1 = arith.constant 0 : i32
    return %c0_i32, %c0_i32_0 : i32, i32
  }
  func.func @transform_3(%arg0: i32) -> (i32, i32) {
    %c0_i32 = arith.constant 0 : i32
    %c0_i32_0 = arith.constant 0 : i32
    %c0_i32_1 = arith.constant 0 : i32
    return %c0_i32, %c0_i32_0 : i32, i32
  }
  func.func @transform_4(%arg0: i32) -> (i32, i32) {
    %c0_i32 = arith.constant 0 : i32
    %c0_i32_0 = arith.constant 0 : i32
    %c0_i32_1 = arith.constant 0 : i32
    return %c0_i32, %c0_i32_0 : i32, i32
  }
  func.func @transform_5(%arg0: i32) -> (i32, i32) {
    %c0_i32 = arith.constant 0 : i32
    %c0_i32_0 = arith.constant 0 : i32
    %c0_i32_1 = arith.constant 0 : i32
    return %c0_i32, %c0_i32_0 : i32, i32
  }
  func.func @transform_6(%arg0: i32) -> (i32, i32) {
    %c0_i32 = arith.constant 0 : i32
    %c0_i32_0 = arith.constant 0 : i32
    %c0_i32_1 = arith.constant 0 : i32
    return %c0_i32, %c0_i32_0 : i32, i32
  }
  func.func @transform_7(%arg0: i32) -> (i32, i32, i32) {
    %c0_i32 = arith.constant 0 : i32
    %c0_i32_0 = arith.constant 0 : i32
    %c0_i32_1 = arith.constant 0 : i32
    return %arg0, %c0_i32, %c0_i32_0 : i32, i32, i32
  }
}

</mosaic_0001>

<bundles_post_ra>
// kernel: heatmap_head.1
= control target key start
LH: loop header
LB: loop body
LE: loop exit
PB: predicated region body
PF: predicated region fallthrough
CT: control target
= control target key end

     0   :  { %s1166_s24 = smov 0   ;;  %s1396_s0 = inlined_call_operand.vmem [shape: f32[2,8,290], index: 0, kind: input, shape index: {}]   ;;  %s1397_s1 = inlined_call_operand.vmem [shape: f32[9,1,256], index: 1, kind: input, shape index: {}]   ;;  %s1398_s2 = inlined_call_operand.vmem [shape: f32[64,72], index: 2, kind: input, shape index: {}]   ;;  %s1399_s3 = inlined_call_operand.vmem [shape: f32[64,1], index: 3, kind: input, shape index: {}]   ;;  %s1400_s4 = inlined_call_operand.vmem [shape: f32[64,1], index: 4, kind: input, shape index: {}]   ;;  %s1401_s5 = inlined_call_operand.vmem [shape: f32[8,64], index: 5, kind: input, shape index: {}]   ;;  %s1402_s6 = inlined_call_operand.vmem [shape: f32[8,1], index: 6, kind: input, shape index: {}]   ;;  %s1403_s7 = inlined_call_operand.vmem [shape: f32[2,8,256], index: 7, kind: output, shape index: {}]  }
   0x1 LB: > { %s1033_s25 = sadd.s32 4294967295, %s1106_s24   ;;  %p1037_p0 = scmp.ge.s32.totalorder %s1106_s24, 1  ;;  %s1106_s24 = sphi %s1166_s24, %s17_s24  }
   0x2   : > { %p237_p1 = scmp.lt.s32.totalorder %s1106_s24, 3 }
   0x4   : > { %p238_p2 = pnand %p1037_p0, %p237_p1 }
   0x5   : > { %s1108_s30 = smov (!%p238_p2), 34   ;;  %s1109_s8 = smov (!%p238_p2), 33  }
   0x6   : > { %241 = sbr.rel (%p238_p2) target bundleno = 778 (0x30a), region = 48  ;;  %s1110_s13 = smov (!%p238_p2), 32  }
   0x7   : > { %s1111_s16 = smov (!%p238_p2), 18   ;;  %s1112_s19 = smov (!%p238_p2), 17  }
   0x8   : > { %s1113_s22 = smov (!%p238_p2), 16   ;;  %s1114_s27 = smov (!%p238_p2), 2  }
   0x9   : > { %s1115_s28 = smov (!%p238_p2), 1   ;;  %p269_p3 = scmp.lt.s32.totalorder (!%p238_p2), %s1033_s25, 1 }
   0xa   : > { %s1116_s10 = smov (!%p238_p2), 94   ;;  %s1117_s11 = smov (!%p238_p2), 95  }
   0xb   : > { %v283_v0 = vlaneseq  ;;  %v1048_v2 = vld [vmem:[%s1397_s1 + $0x10] sm:$0x3]  ;;  %v1047_v3 = vld [vmem:[%s1397_s1 + $0xe] sm:$0x3]  ;;  %v1046_v10 = vld [vmem:[%s1397_s1 + $0xc] sm:$0x3] }
   0xc   : > { %v1045_v13 = vld [vmem:[%s1397_s1 + $0xa] sm:$0x3]  ;;  %v1044_v16 = vld [vmem:[%s1397_s1 + $0x8] sm:$0x3]  ;;  %v1043_v19 = vld [vmem:[%s1397_s1 + $0x6] sm:$0x3] }
   0xd   : > { %v284_v1 = vshrl.u32 %v283_v0, 7  ;;  %v1042_v22 = vld [vmem:[%s1397_s1 + $0x4] sm:$0x3]  ;;  %v1041_v25 = vld [vmem:[%s1397_s1 + $0x2] sm:$0x3]  ;;  %s1405_s25 = smov (!%p269_p3, %s1033_s25), 1 }
   0xe   : > { %s1063_s29 = smul.u32 24, %s1405_s25  ;;  %s1118_s12 = smov 96   ;;  %vm472_vm0 = vcmask 277504   ;;  %vm449_vm1 = vcmask 269312   ;;  %vm426_vm2 = vcmask 261120   ;;  %vm403_vm3 = vcmask 146432  }
   0xf   : > { %v1180_v4 = vsub.s32 0, %v284_v1  ;;  %v1182_v5 = vsub.s32 1, %v284_v1  ;;  %s1120_s14 = smov 111   ;;  %s1121_s15 = smov 112   ;;  %vm380_vm4 = vcmask 138240   ;;  %vm357_vm5 = vcmask 130048  }
  0x10   : > { %s1228_s9 = scalar_lea.vmem %s1396_s0, %s1063_s29  ;;  %vm334_vm6 = vcmask 15360   ;;  %vm311_vm7 = vcmask 7168   ;;  %s1124_s17 = smov 127   ;;  %vm587_vm8 = vcmask 769024   ;;  %vm573_vm9 = vcmask 777216  }
  0x11   : > { %v463_v6 = vrot.slane %v1048_v2, %v1180_v4  ;;  %v440_v7 = vrot.slane %v1047_v3, %v1180_v4  ;;  %v467_v8 = vrot.slane %v1048_v2, %v1182_v5  ;;  %v444_v9 = vrot.slane %v1047_v3, %v1182_v5  ;;  %v1231_v28 = vld [vmem:[%s1228_s9] sm:$0xff]  ;;  %v1235_v32 = vld [vmem:[%s1228_s9 + $0x10] sm:$0xff]  ;;  %v1261_v57 = vld [vmem:[%s1228_s9 + $0x8] sm:$0xff]  ;;  %s1062_s9 = sshll.u32 %s1405_s25, 4 }
  0x12   : > { %v421_v11 = vrot.slane %v1046_v10, %v1182_v5  ;;  %v417_v12 = vrot.slane %v1046_v10, %v1180_v4  ;;  %v398_v14 = vrot.slane %v1045_v13, %v1182_v5  ;;  %v394_v15 = vrot.slane %v1045_v13, %v1180_v4 }
  0x13   : > { %468 = vrot.lane.b32.xlu0 %v463_v6, %s1108_s30  ;;  %445 = vrot.lane.b32.xlu1 %v440_v7, %s1109_s8  ;;  %v375_v17 = vrot.slane %v1044_v16, %v1182_v5  ;;  %v371_v18 = vrot.slane %v1044_v16, %v1180_v4  ;;  %v352_v20 = vrot.slane %v1043_v19, %v1182_v5  ;;  %vm559_vm10 = vcmask 785408  }
  0x14   : > { %v348_v21 = vrot.slane %v1043_v19, %v1180_v4  ;;  %v325_v23 = vrot.slane %v1042_v22, %v1180_v4  ;;  %v329_v24 = vrot.slane %v1042_v22, %v1182_v5  ;;  %v306_v26 = vrot.slane %v1041_v25, %v1182_v5  ;;  %v744_v19 = vld [vmem:[%s1399_s3 + $0x30] sm:$0xff]  ;;  %v809_v22 = vld [vmem:[%s1400_s4 + $0x38] sm:$0xff] }
  0x15   : > { %v302_v27 = vrot.slane %v1041_v25, %v1180_v4  ;;  %v741_v25 = vld [vmem:[%s1399_s3 + $0x18] sm:$0xff]  ;;  %vm545_vm11 = vcmask 900096   ;;  %vm531_vm12 = vcmask 908288   ;;  %vm517_vm13 = vcmask 916480  }
  0x16   : > { %vm503_vm14 = vcmask 1031168   ;;  %vm489_vm15 = vcmask 1039360  }
  0x17   : > { %470 = vrot.lane.b32.xlu0 %v467_v8, %s1108_s30  ;;  %447 = vrot.lane.b32.xlu1 %v444_v9, %s1109_s8 }
  0x1b   : > { %424 = vrot.lane.b32.xlu1 %v421_v11, %s1110_s13  ;;  %422 = vrot.lane.b32.xlu0 %v417_v12, %s1110_s13  ;;  %s1119_s13 = smov 110  }
  0x1f   : > { %401 = vrot.lane.b32.xlu1 %v398_v14, %s1111_s16  ;;  %399 = vrot.lane.b32.xlu0 %v394_v15, %s1111_s16  ;;  %s1122_s16 = smov 126   ;;  %v1123_v14 = vmov 0.0  }
  0x20   : > { %689 = vmatprep.mubr.f32.mxu0 %v1123_v14  ;;  %957 = vmatprep.mubr.f32.mxu1 %v1123_v14 }
  0x23   : > { %378 = vrot.lane.b32.xlu1 %v375_v17, %s1112_s19  ;;  %376 = vrot.lane.b32.xlu0 %v371_v18, %s1112_s19  ;;  %v745_v18 = vld [vmem:[%s1399_s3 + $0x38] sm:$0xff] }
  0x27   : > { %355 = vrot.lane.b32.xlu1 %v352_v20, %s1113_s22  ;;  %353 = vrot.lane.b32.xlu0 %v348_v21, %s1113_s22  ;;  %v1125_v20 = vmov 0   ;;  %v743_v21 = vld [vmem:[%s1399_s3 + $0x28] sm:$0xff] }
  0x28   : > { %1090 = vset.pattern.permute.xlu0 %v1125_v20  ;;  %1091 = vset.pattern.permute.xlu1 %v1125_v20 }
  0x2b   : > { %330 = vrot.lane.b32.xlu0 %v325_v23, %s1114_s27  ;;  %332 = vrot.lane.b32.xlu1 %v329_v24, %s1114_s27  ;;  %v742_v23 = vld [vmem:[%s1399_s3 + $0x20] sm:$0xff]  ;;  %v808_v24 = vld [vmem:[%s1400_s4 + $0x30] sm:$0xff] }
  0x2f   : > { %309 = vrot.lane.b32.xlu1 %v306_v26, %s1115_s28  ;;  %307 = vrot.lane.b32.xlu0 %v302_v27, %s1115_s28  ;;  %v807_v26 = vld [vmem:[%s1400_s4 + $0x28] sm:$0xff]  ;;  %v740_v27 = vld [vmem:[%s1399_s3 + $0x10] sm:$0xff] }
  0x85   : > { %v469_v29 = vpop.permute.xlu0 %468  ;;  %v446_v30 = vpop.permute.xlu1 %445 }
  0x86   : > { %v477_v31 = vmul.f32 %v469_v29, %v1231_v28  ;;  %v454_v39 = vmul.f32 %v446_v30, %v1231_v28 }
  0x88   : > { %581 = vrot.lane.b32.xlu0 %v477_v31, %s1116_s10  ;;  %v805_v31 = vld [vmem:[%s1400_s4 + $0x18] sm:$0xff] }
  0x89   : > { %v471_v33 = vpop.permute.xlu0 %470  ;;  %v448_v34 = vpop.permute.xlu1 %447 }
  0x8a   : > { %v479_v35 = vmul.f32 %v471_v33, %v1235_v32  ;;  %v456_v36 = vmul.f32 %v448_v34, %v1235_v32  ;;  %v473_v58 = vsel %vm472_vm0, %v469_v29, %v471_v33  ;;  %v450_v61 = vsel %vm449_vm1, %v446_v30, %v448_v34  ;;  %v806_v29 = vld [vmem:[%s1400_s4 + $0x20] sm:$0xff]  ;;  %v739_v30 = vld [vmem:[%s1399_s3 + $0x8] sm:$0xff]  ;;  %v804_v33 = vld [vmem:[%s1400_s4 + $0x10] sm:$0xff] }
  0x8b   : > { %v478_v60 = vmul.f32 %v473_v58, %v1261_v57  ;;  %v455_v63 = vmul.f32 %v450_v61, %v1261_v57  ;;  %v802_v34 = vld [vmem:[%s1400_s4] sm:$0xff]  ;;  %vm600_vm0 = vcmask 588800   ;;  %vm889_vm1 = vcmask 523264  }
  0x8c   : > { %585 = vrot.lane.b32.xlu1 %v479_v35, %s1116_s10  ;;  %571 = vrot.lane.b32.xlu0 %v456_v36, %s1117_s11  ;;  %v803_v35 = vld [vmem:[%s1400_s4 + $0x8] sm:$0xff]  ;;  %v883_v36 = vld [vmem:[%s1402_s6] sm:$0xff] }
  0x8d   : > { %v425_v37 = vpop.permute.xlu1 %424  ;;  %v423_v38 = vpop.permute.xlu0 %422 }
  0x8e   : > { %v431_v40 = vmul.f32 %v423_v38, %v1231_v28  ;;  %v433_v41 = vmul.f32 %v425_v37, %v1235_v32  ;;  %v427_v62 = vsel %vm426_vm2, %v423_v38, %v425_v37 }
  0x8f   : > { %v432_v0 = vmul.f32 %v427_v62, %v1261_v57 }
  0x90   : > { %567 = vrot.lane.b32.xlu1 %v454_v39, %s1117_s11  ;;  %553 = vrot.lane.b32.xlu0 %v431_v40, %s1118_s12 }
  0x91   : > { %v402_v42 = vpop.permute.xlu1 %401  ;;  %v400_v43 = vpop.permute.xlu0 %399 }
  0x92   : > { %v410_v44 = vmul.f32 %v402_v42, %v1235_v32  ;;  %v408_v45 = vmul.f32 %v400_v43, %v1231_v28  ;;  %v404_v1 = vsel %vm403_vm3, %v400_v43, %v402_v42 }
  0x93   : > { %v409_v3 = vmul.f32 %v404_v1, %v1261_v57 }
  0x94   : > { %557 = vrot.lane.b32.xlu1 %v433_v41, %s1118_s12  ;;  %543 = vrot.lane.b32.xlu0 %v410_v44, %s1119_s13 }
  0x95   : > { %v379_v46 = vpop.permute.xlu1 %378  ;;  %v377_v47 = vpop.permute.xlu0 %376 }
  0x96   : > { %v385_v48 = vmul.f32 %v377_v47, %v1231_v28  ;;  %v387_v49 = vmul.f32 %v379_v46, %v1235_v32  ;;  %v381_v2 = vsel %vm380_vm4, %v377_v47, %v379_v46 }
  0x97   : > { %v386_v6 = vmul.f32 %v381_v2, %v1261_v57 }
  0x98   : > { %539 = vrot.lane.b32.xlu1 %v408_v45, %s1119_s13  ;;  %525 = vrot.lane.b32.xlu0 %v385_v48, %s1120_s14 }
  0x99   : > { %v356_v50 = vpop.permute.xlu1 %355  ;;  %v354_v51 = vpop.permute.xlu0 %353 }
  0x9a   : > { %v364_v52 = vmul.f32 %v356_v50, %v1235_v32  ;;  %v362_v53 = vmul.f32 %v354_v51, %v1231_v28  ;;  %v358_v9 = vsel %vm357_vm5, %v354_v51, %v356_v50 }
  0x9b   : > { %v363_v12 = vmul.f32 %v358_v9, %v1261_v57 }
  0x9c   : > { %529 = vrot.lane.b32.xlu1 %v387_v49, %s1120_s14  ;;  %515 = vrot.lane.b32.xlu0 %v364_v52, %s1121_s15 }
  0x9d   : > { %v331_v54 = vpop.permute.xlu0 %330  ;;  %v333_v55 = vpop.permute.xlu1 %332 }
  0x9e   : > { %v339_v56 = vmul.f32 %v331_v54, %v1231_v28  ;;  %v341_v59 = vmul.f32 %v333_v55, %v1235_v32  ;;  %v335_v10 = vsel %vm334_vm6, %v331_v54, %v333_v55 }
  0x9f   : > { %v340_v13 = vmul.f32 %v335_v10, %v1261_v57 }
  0xa0   : > { %511 = vrot.lane.b32.xlu1 %v362_v53, %s1121_s15  ;;  %497 = vrot.lane.b32.xlu0 %v339_v56, %s1122_s16 }
  0xa1   : > { %v310_v7 = vpop.permute.xlu1 %309  ;;  %v308_v8 = vpop.permute.xlu0 %307 }
  0xa2   : > { %v312_v11 = vsel %vm311_vm7, %v308_v8, %v310_v7  ;;  %v318_v15 = vmul.f32 %v310_v7, %v1235_v32  ;;  %v316_v17 = vmul.f32 %v308_v8, %v1231_v28  ;;  %v738_v32 = vld [vmem:[%s1399_s3] sm:$0xff] }
  0xa3   : > { %v317_v16 = vmul.f32 %v312_v11, %v1261_v57  ;;  %v281_v7 = vld [vmem:[%s1397_s1] sm:$0x3] }
  0xa4   : > { %501 = vrot.lane.b32.xlu1 %v341_v59, %s1122_s16  ;;  %583 = vrot.lane.b32.xlu0 %v478_v60, %s1116_s10  ;;  %v290_v11 = vrot.slane %v281_v7, %v1182_v5  ;;  %v592_v5 = vld [vmem:[%s1398_s2] sm:$0xff] }
  0xa8   : > { %569 = vrot.lane.b32.xlu1 %v455_v63, %s1117_s11  ;;  %555 = vrot.lane.b32.xlu0 %v432_v0, %s1118_s12  ;;  %s278_s12 = scalar_lea.vmem %s1403_s7, %s1062_s9 }
  0xac   : > { %541 = vrot.lane.b32.xlu1 %v409_v3, %s1119_s13  ;;  %527 = vrot.lane.b32.xlu0 %v386_v6, %s1120_s14 }
  0xb0   : > { %513 = vrot.lane.b32.xlu1 %v363_v12, %s1121_s15  ;;  %499 = vrot.lane.b32.xlu0 %v340_v13, %s1122_s16 }
  0xb4   : > { %485 = vrot.lane.b32.xlu1 %v317_v16, %s1124_s17  ;;  %487 = vrot.lane.b32.xlu0 %v318_v15, %s1124_s17  ;;  %v286_v16 = vrot.slane %v281_v7, %v1180_v4  ;;  %v593_v4 = vld [vmem:[%s1398_s2 + $0x8] sm:$0xff] }
  0xb6   : > { %v293_v20 = vmul.f32 %v286_v16, %v1231_v28  ;;  %v594_v28 = vld [vmem:[%s1398_s2 + $0x10] sm:$0xff] }
  0xb8   : > { %483 = vrot.lane.b32.xlu1 %v316_v17, %s1124_s17  ;;  %783 = vperm.xlu0 %1090, %v745_v18   ;;  %v294_v18 = vmul.f32 %v290_v11, %v1261_v57  ;;  %v595_v57 = vld [vmem:[%s1398_s2 + $0x18] sm:$0xff] }
  0xbc   : > { %778 = vperm.xlu1 %1091, %v744_v19   ;;  %773 = vperm.xlu0 %1090, %v743_v21  }
  0xc0   : > { %847 = vperm.xlu1 %1091, %v809_v22   ;;  %768 = vperm.xlu0 %1090, %v742_v23   ;;  %v596_v22 = vld [vmem:[%s1398_s2 + $0x20] sm:$0xff]  ;;  %v597_v23 = vld [vmem:[%s1398_s2 + $0x28] sm:$0xff] }
  0xc4   : > { %842 = vperm.xlu1 %1091, %v808_v24   ;;  %763 = vperm.xlu0 %1090, %v741_v25   ;;  %v598_v24 = vld [vmem:[%s1398_s2 + $0x30] sm:$0xff]  ;;  %v599_v25 = vld [vmem:[%s1398_s2 + $0x38] sm:$0xff] }
  0xc8   : > { %837 = vperm.xlu1 %1091, %v807_v26   ;;  %758 = vperm.xlu0 %1090, %v740_v27  }
  0xcc   : > { %832 = vperm.xlu1 %1091, %v806_v29   ;;  %753 = vperm.xlu0 %1090, %v739_v30  }
  0xd0   : > { %827 = vperm.xlu1 %1091, %v805_v31   ;;  %748 = vperm.xlu0 %1090, %v738_v32  }
  0xd4   : > { %822 = vperm.xlu1 %1091, %v804_v33   ;;  %812 = vperm.xlu0 %1090, %v802_v34  }
  0xd8   : > { %817 = vperm.xlu1 %1091, %v803_v35  }
  0xdc   : > { %886 = vperm.xlu1 %1091, %v883_v36  }
  0xfa   : > { %v582_v37 = vpop.permute.xlu0 %581 }
  0xfe   : > { %v586_v38 = vpop.permute.xlu1 %585  ;;  %v572_v39 = vpop.permute.xlu0 %571 }
 0x102   : > { %v568_v40 = vpop.permute.xlu1 %567  ;;  %v554_v41 = vpop.permute.xlu0 %553 }
 0x106   : > { %v558_v42 = vpop.permute.xlu1 %557  ;;  %v544_v43 = vpop.permute.xlu0 %543 }
 0x10a   : > { %v540_v44 = vpop.permute.xlu1 %539  ;;  %v526_v45 = vpop.permute.xlu0 %525 }
 0x10e   : > { %v530_v46 = vpop.permute.xlu1 %529  ;;  %v516_v47 = vpop.permute.xlu0 %515 }
 0x112   : > { %v512_v48 = vpop.permute.xlu1 %511  ;;  %v498_v49 = vpop.permute.xlu0 %497 }
 0x116   : > { %v502_v50 = vpop.permute.xlu1 %501  ;;  %v584_v51 = vpop.permute.xlu0 %583 }
 0x117   : > { %v589_v52 = vsel %vm587_vm8, %v584_v51, %v586_v38  ;;  %v588_v53 = vsel %vm587_vm8, %v582_v37, %v584_v51 }
 0x118   : > { %639 = vmatprep.subr.mxu0 %v589_v52 }
 0x119   : > { %640 = vmatpush1.msra.mxu0 %v588_v53 }
 0x11a   : > { %v570_v54 = vpop.permute.xlu1 %569  ;;  %v556_v55 = vpop.permute.xlu0 %555 }
 0x11b   : > { %v575_v56 = vsel %vm573_vm9, %v570_v54, %v572_v39  ;;  %v574_v58 = vsel %vm573_vm9, %v568_v40, %v570_v54  ;;  %v561_v59 = vsel %vm559_vm10, %v556_v55, %v558_v42  ;;  %v560_v62 = vsel %vm559_vm10, %v554_v41, %v556_v55 }
 0x11c   : > { %641 = vmatprep.subr.mxu0 %v575_v56 }
 0x11d   : > { %642 = vmatpush1.msra.mxu0 %v574_v58 }
 0x11e   : > { %v542_v60 = vpop.permute.xlu1 %541  ;;  %643 = vmatprep.subr.mxu0 %v561_v59  ;;  %v528_v61 = vpop.permute.xlu0 %527 }
 0x11f   : > { %644 = vmatpush1.msra.mxu0 %v560_v62  ;;  %v547_v63 = vsel %vm545_vm11, %v542_v60, %v544_v43  ;;  %v546_v0 = vsel %vm545_vm11, %v540_v44, %v542_v60  ;;  %v533_v1 = vsel %vm531_vm12, %v528_v61, %v530_v46  ;;  %v532_v6 = vsel %vm531_vm12, %v526_v45, %v528_v61 }
 0x120   : > { %645 = vmatprep.subr.mxu0 %v547_v63 }
 0x121   : > { %646 = vmatpush1.msra.mxu0 %v546_v0 }
 0x122   : > { %v514_v2 = vpop.permute.xlu1 %513  ;;  %647 = vmatprep.subr.mxu0 %v533_v1  ;;  %v500_v3 = vpop.permute.xlu0 %499 }
 0x123   : > { %648 = vmatpush1.msra.mxu0 %v532_v6  ;;  %v519_v8 = vsel %vm517_vm13, %v514_v2, %v516_v47  ;;  %v518_v9 = vsel %vm517_vm13, %v512_v48, %v514_v2  ;;  %v505_v10 = vsel %vm503_vm14, %v500_v3, %v502_v50  ;;  %v504_v15 = vsel %vm503_vm14, %v498_v49, %v500_v3 }
 0x124   : > { %649 = vmatprep.subr.mxu0 %v519_v8 }
 0x125   : > { %650 = vmatpush1.msra.mxu0 %v518_v9 }
 0x126   : > { %v486_v12 = vpop.permute.xlu1 %485  ;;  %651 = vmatprep.subr.mxu0 %v505_v10  ;;  %v488_v13 = vpop.permute.xlu0 %487 }
 0x127   : > { %652 = vmatpush1.msra.mxu0 %v504_v15  ;;  %v491_v17 = vsel %vm489_vm15, %v486_v12, %v488_v13 }
 0x128   : > { %653 = vmatprep.subr.mxu0 %v491_v17 }
 0x12a   : > { %v484_v19 = vpop.permute.xlu1 %483 }
 0x12b   : > { %v490_v21 = vsel %vm489_vm15, %v484_v19, %v486_v12 }
 0x12c   : > { %654 = vmatpush1.msra.mxu0 %v490_v21 }
 0x12d   : > { %655 = vmatprep.subr.mxu0 %v294_v18 }
 0x12e   : > { %656 = vmatpush1.msra.mxu0 %v293_v20 }
 0x12f   : > { %1049 = vmatmul.mubr.msk.f32.vlgmr.msra.gmra.mxu0 %vm600_vm0, %v592_v5 }
 0x130   : > { %695 = vmatprep.mubr.f32.mxu0 %v1123_v14 }
 0x133   : > { %1050 = vmatmul.mubr.msk.f32.gmra.mxu0 %vm600_vm0, %v593_v4  ;;  %v784_v29 = vpop.permute.xlu0 %783 }
 0x134   : > { %701 = vmatprep.mubr.f32.mxu0 %v1123_v14 }
 0x137   : > { %1051 = vmatmul.mubr.msk.f32.gmra.mxu0 %vm600_vm0, %v594_v28  ;;  %v779_v26 = vpop.permute.xlu1 %778  ;;  %v774_v34 = vpop.permute.xlu0 %773 }
 0x138   : > { %707 = vmatprep.mubr.f32.mxu0 %v1123_v14 }
 0x13b   : > { %1052 = vmatmul.mubr.msk.f32.gmra.mxu0 %vm600_vm0, %v595_v57  ;;  %v848_v32 = vpop.permute.xlu1 %847 }
 0x13c   : > { %713 = vmatprep.mubr.f32.mxu0 %v1123_v14 }
 0x13f   : > { %1053 = vmatmul.mubr.msk.f32.gmra.mxu0 %vm600_vm0, %v596_v22  ;;  %v843_v37 = vpop.permute.xlu1 %842 }
 0x140   : > { %719 = vmatprep.mubr.f32.mxu0 %v1123_v14 }
 0x143   : > { %1054 = vmatmul.mubr.msk.f32.gmra.mxu0 %vm600_vm0, %v597_v23  ;;  %v838_v41 = vpop.permute.xlu1 %837 }
 0x144   : > { %725 = vmatprep.mubr.f32.mxu0 %v1123_v14 }
 0x147   : > { %1055 = vmatmul.mubr.msk.f32.gmra.mxu0 %vm600_vm0, %v598_v24  ;;  %v833_v46 = vpop.permute.xlu1 %832 }
 0x148   : > { %731 = vmatprep.mubr.f32.mxu0 %v1123_v14  ;;  %v769_v14 = vpop.permute.xlu0 %768 }
 0x14b   : > { %1056 = vmatmul.mubr.msk.f32.gmra.mxu0 %vm600_vm0, %v599_v25  ;;  %v828_v51 = vpop.permute.xlu1 %827 }
 0x14c   : > { %v764_v43 = vpop.permute.xlu0 %763 }
 0x14f   : > { %v823_v3 = vpop.permute.xlu1 %822 }
 0x150   : > { %v759_v48 = vpop.permute.xlu0 %758 }
 0x153   : > { %v818_v23 = vpop.permute.xlu1 %817 }
 0x154   : > { %v754_v56 = vpop.permute.xlu0 %753 }
 0x158   : > { %v749_v12 = vpop.permute.xlu0 %748 }
 0x1ef   : > { %v1383_v27 = vpop.f32.mrf.mxu0 }
 0x1f1   : > { %v693_v30 = vpop.f32.mrf.mxu0 }
 0x1f2   : > { %v787_v22 = vmul.f32 %v749_v12, %v693_v30 }
 0x1f3   : > { %v697_v31 = vpop.f32.mrf.mxu0 }
 0x1f4   : > { %v788_v4 = vmul.f32 %v754_v56, %v697_v31 }
 0x1f5   : > { %v699_v33 = vpop.f32.mrf.mxu0 }
 0x1f6   : > { %v789_v20 = vmul.f32 %v754_v56, %v699_v33 }
 0x1f7   : > { %v703_v35 = vpop.f32.mrf.mxu0 }
 0x1f8   : > { %v790_v17 = vmul.f32 %v759_v48, %v703_v35  ;;  %v853_v35 = vadd.f32 %v818_v23, %v789_v20 }
 0x1f9   : > { %v705_v36 = vpop.f32.mrf.mxu0 }
 0x1fa   : > { %v791_v13 = vmul.f32 %v759_v48, %v705_v36  ;;  %v852_v36 = vadd.f32 %v818_v23, %v788_v4 }
 0x1fb   : > { %v709_v38 = vpop.f32.mrf.mxu0 }
 0x1fc   : > { %v792_v9 = vmul.f32 %v764_v43, %v709_v38  ;;  %v855_v24 = vadd.f32 %v823_v3, %v791_v13 }
 0x1fd   : > { %v711_v39 = vpop.f32.mrf.mxu0 }
 0x1fe   : > { %v793_v6 = vmul.f32 %v764_v43, %v711_v39  ;;  %v856_v28 = vadd.f32 %v828_v51, %v792_v9  ;;  %v871_v38 = vmax.f32 %v855_v24, 0.0  ;;  %v869_v39 = vmax.f32 %v853_v35, 0.0  ;;  %v887_v43 = vpop.permute.xlu1 %886 }
 0x1ff   : > { %v715_v40 = vpop.f32.mrf.mxu0 }
 0x200   : > { %v794_v1 = vmul.f32 %v769_v14, %v715_v40  ;;  %v857_v21 = vadd.f32 %v828_v51, %v793_v6  ;;  %v868_v40 = vmax.f32 %v852_v36, 0.0 }
 0x201   : > { %v717_v42 = vpop.f32.mrf.mxu0 }
 0x202   : > { %v795_v62 = vmul.f32 %v769_v14, %v717_v42  ;;  %v858_v18 = vadd.f32 %v833_v46, %v794_v1  ;;  %v873_v33 = vmax.f32 %v857_v21, 0.0  ;;  %v882_v42 = vld [vmem:[%s1401_s5] sm:$0xff] }
 0x203   : > { %v721_v44 = vpop.f32.mrf.mxu0 }
 0x204   : > { %v796_v60 = vmul.f32 %v774_v34, %v721_v44  ;;  %v859_v15 = vadd.f32 %v833_v46, %v795_v62 }
 0x205   : > { %v723_v45 = vpop.f32.mrf.mxu0 }
 0x206   : > { %v797_v58 = vmul.f32 %v774_v34, %v723_v45  ;;  %v860_v10 = vadd.f32 %v838_v41, %v796_v60  ;;  %v875_v25 = vmax.f32 %v859_v15, 0.0  ;;  %v813_v34 = vpop.permute.xlu0 %812 }
 0x207   : > { %v727_v47 = vpop.f32.mrf.mxu0  ;;  %v851_v31 = vadd.f32 %v813_v34, %v787_v22 }
 0x208   : > { %v798_v54 = vmul.f32 %v779_v26, %v727_v47  ;;  %v861_v7 = vadd.f32 %v838_v41, %v797_v58  ;;  %v876_v57 = vmax.f32 %v860_v10, 0.0 }
 0x209   : > { %v729_v49 = vpop.f32.mrf.mxu0 }
 0x20a   : > { %v799_v52 = vmul.f32 %v779_v26, %v729_v49  ;;  %v862_v2 = vadd.f32 %v843_v37, %v798_v54  ;;  %v877_v5 = vmax.f32 %v861_v7, 0.0  ;;  %v786_v26 = vmul.f32 %v749_v12, %v1383_v27 }
 0x20b   : > { %v733_v50 = vpop.f32.mrf.mxu0  ;;  %v867_v27 = vmax.f32 %v851_v31, 0.0 }
 0x20c   : > { %v800_v53 = vmul.f32 %v784_v29, %v733_v50  ;;  %v863_v63 = vadd.f32 %v843_v37, %v799_v52  ;;  %v878_v19 = vmax.f32 %v862_v2, 0.0  ;;  %v872_v37 = vmax.f32 %v856_v28, 0.0 }
 0x20d   : > { %v735_v55 = vpop.f32.mrf.mxu0  ;;  %v850_v30 = vadd.f32 %v813_v34, %v786_v26 }
 0x20e   : > { %v801_v59 = vmul.f32 %v784_v29, %v735_v55  ;;  %v864_v61 = vadd.f32 %v848_v32, %v800_v53  ;;  %v879_v16 = vmax.f32 %v863_v63, 0.0  ;;  %v854_v29 = vadd.f32 %v823_v3, %v790_v17 }
 0x20f   : > { %v866_v41 = vmax.f32 %v850_v30, 0.0 }
 0x210   : > { %v865_v0 = vadd.f32 %v848_v32, %v801_v59  ;;  %v880_v11 = vmax.f32 %v864_v61, 0.0  ;;  %v874_v32 = vmax.f32 %v858_v18, 0.0  ;;  %v870_v14 = vmax.f32 %v854_v29, 0.0 }
 0x212   : > { %v881_v8 = vmax.f32 %v865_v0, 0.0 }
 0x214   : > { %909 = vmatprep.subr.mxu1 %v881_v8 }
 0x215   : > { %910 = vmatpush1.msra.mxu1 %v880_v11 }
 0x216   : > { %911 = vmatprep.subr.mxu1 %v879_v16 }
 0x217   : > { %912 = vmatpush1.msra.mxu1 %v878_v19 }
 0x218   : > { %913 = vmatprep.subr.mxu1 %v877_v5 }
 0x219   : > { %914 = vmatpush1.msra.mxu1 %v876_v57 }
 0x21a   : > { %915 = vmatprep.subr.mxu1 %v875_v25 }
 0x21b   : > { %916 = vmatpush1.msra.mxu1 %v874_v32 }
 0x21c   : > { %917 = vmatprep.subr.mxu1 %v873_v33 }
 0x21d   : > { %918 = vmatpush1.msra.mxu1 %v872_v37 }
 0x21e   : > { %919 = vmatprep.subr.mxu1 %v871_v38 }
 0x21f   : > { %920 = vmatpush1.msra.mxu1 %v870_v14 }
 0x220   : > { %921 = vmatprep.subr.mxu1 %v869_v39 }
 0x221   : > { %922 = vmatpush1.msra.mxu1 %v868_v40 }
 0x222   : > { %923 = vmatprep.subr.mxu1 %v867_v27 }
 0x223   : > { %924 = vmatpush1.msra.mxu1 %v866_v41 }
 0x224   : > { %1057 = vmatmul.mubr.msk.f32.vlgmr.msra.gmra.mxu1 %vm889_vm1, %v882_v42 }
 0x2e4   : > { %v959_v44 = vpop.f32.mrf.mxu1 }
 0x2e5   : > { %v960_v45 = vadd.f32 %v959_v44, %v887_v43 }
 0x2e6   : > { %v961_v46 = vpop.f32.mrf.mxu1 }
 0x2e7   : > { %v1058_v47 = vmul.f32 -1.442695, %v960_v45  ;;  %v962_v48 = vadd.f32 %v961_v46, %v887_v43 }
 0x2e9   : > { %1092 = vpow2.f32 %v1058_v47  ;;  %v1059_v49 = vmul.f32 -1.442695, %v962_v48 }
 0x2eb   : > { %1094 = vpow2.f32 %v1059_v49 }
 0x2f6   : > { %v1093_v50 = vpop.eup %1092 }
 0x2f7   : > { %v970_v51 = vadd.f32 1.0, %v1093_v50 }
 0x2f8   : > { %v1095_v52 = vpop.eup %1094 }
 0x2f9   : > { %1096 = vrcp.f32 %v970_v51  ;;  %v971_v53 = vadd.f32 1.0, %v1095_v52 }
 0x2fb   : > { %1098 = vrcp.f32 %v971_v53 }
 0x306   : > { %v1097_v54 = vpop.eup %1096 }
 0x307   : > { %976 = vst [vmem:[%s278_s12] sm:$0xff] %v1097_v54 }
 0x308   : > { %v1099_v55 = vpop.eup %1098 }
 0x309   : > { %977 = vst [vmem:[%s278_s12 + $0x8] sm:$0xff] %v1099_v55 }
 0x30a PF: > { %s17_s24 = sadd.s32 1, %s1106_s24  }
 0x30b   : > { %p14_p4 = scmp.ge.s32.totalorder %s17_s24, 4  }
 0x30d   :  { %16 = sbr.rel (!%p14_p4) target bundleno = 1 (0x1), region = 86 }

</bundles_post_ra>
